<compile_context>
chip_gen: v7x
topology: tpu7x:2x2x1
jax: 0.10.0
libtpu: 0.0.40
codegen_flags: <defaults>
</compile_context>

<pallas_src>
import jax
import jax.numpy as jnp
from jax.experimental import pallas as pl
from jax.experimental.pallas import tpu as pltpu

LANE = 128        # TPU lane width (last vreg dim)
SUBLANE = 8       # TPU sublane width (second-to-last vreg dim, f32)
NEG_BIG = -1e30   # bias for padded action rows -> exp underflows to exactly 0


def _round_up(n, m):
    return ((n + m - 1) // m) * m


def _reinforce_kernel(xt_ref, w1t_ref, b1t_ref, w2t_ref, b2t_ref, out_ref):
    """Transposed fused MLP + softmax.

    Shapes (TB = batch tile on the lane axis):
      xt_ref  : (n_obs_p, TB)      w1t_ref : (hidden, n_obs_p)  b1t_ref : (hidden, 1)
      w2t_ref : (n_out_p, hidden)  b2t_ref : (n_out_p, 1)       out_ref : (n_out_p, TB)
    """
    # fc1^T: (hidden, n_obs_p) @ (n_obs_p, TB) + (hidden, 1), then ReLU.
    ht = jnp.dot(w1t_ref[...], xt_ref[...], preferred_element_type=jnp.float32)
    ht = jnp.maximum(ht + b1t_ref[...], 0.0)

    # dropout: identity (eval mode).

    # fc2^T: (n_out_p, hidden) @ (hidden, TB) + (n_out_p, 1).
    logits_t = (jnp.dot(w2t_ref[...], ht, preferred_element_type=jnp.float32)
                + b2t_ref[...])

    # Numerically stable softmax over the sublane (action) axis.  Padded action
    # rows have logit -1e30 -> exp(...) == 0, so max and denom are unaffected.
    m = jnp.max(logits_t, axis=0, keepdims=True)       # (1, TB)
    e = jnp.exp(logits_t - m)                           # (n_out_p, TB)
    denom = jnp.sum(e, axis=0, keepdims=True)           # (1, TB)

    # Approx reciprocal on the EUP + one Newton step for ~f32 accuracy.
    r = pl.reciprocal(denom, approx=True)
    r = r * (2.0 - denom * r)

    out_ref[...] = (e * r).astype(out_ref.dtype)


def mc_reinforce_forward(x, w1, b1, w2, b2, *, block_batch=4096):
    """Fused fc1 -> ReLU -> (eval dropout) -> fc2 -> softmax.

    x : (batch, n_obs); w1 : (n_obs, hidden); b1 : (1, hidden);
    w2 : (hidden, n_actions); b2 : (1, n_actions).
    Returns (batch, n_actions) action probabilities (f32).
    """
    batch, n_obs = x.shape
    hidden = w1.shape[1]
    n_actions = w2.shape[1]

    n_obs_p = _round_up(n_obs, SUBLANE)
    n_out_p = _round_up(n_actions, SUBLANE)

    # --- Batch tiling: batch lives on the lane axis -> tiles are multiples of
    # 128.  Keep padding tight; use an even number of grid steps when there is
    # enough work so v7x's two TensorCores both get a share.
    n_steps = pl.cdiv(batch, block_batch)
    if batch >= 2 * LANE and n_steps % 2 == 1:
        n_steps += 1
    tb = _round_up(pl.cdiv(batch, n_steps), LANE)
    batch_p = n_steps * tb

    # --- Kernel-layout (transposed, padded) operands; all tiny except x^T. ---
    xt = jnp.pad(x.T, ((0, n_obs_p - n_obs), (0, batch_p - batch)))
    w1t = jnp.pad(w1.T, ((0, 0), (0, n_obs_p - n_obs)))              # (hidden, n_obs_p)
    b1t = b1.reshape(-1, 1)                                           # (hidden, 1)
    w2t = jnp.pad(w2.T, ((0, n_out_p - n_actions), (0, 0)))          # (n_out_p, hidden)
    b2t = jnp.pad(b2.reshape(-1, 1), ((0, n_out_p - n_actions), (0, 0)),
                  constant_values=NEG_BIG)                            # (n_out_p, 1)

    out_t = pl.pallas_call(
        _reinforce_kernel,
        out_shape=jax.ShapeDtypeStruct((n_out_p, batch_p), jnp.float32),
        grid=(n_steps,),
        in_specs=[
            pl.BlockSpec((n_obs_p, tb), lambda i: (0, i)),   # x^T tiled over batch lanes
            pl.BlockSpec(w1t.shape, lambda i: (0, 0)),        # weights/biases: VMEM resident
            pl.BlockSpec(b1t.shape, lambda i: (0, 0)),
            pl.BlockSpec(w2t.shape, lambda i: (0, 0)),
            pl.BlockSpec(b2t.shape, lambda i: (0, 0)),
        ],
        out_specs=pl.BlockSpec((n_out_p, tb), lambda i: (0, i)),
        compiler_params=pltpu.CompilerParams(
            dimension_semantics=("parallel",),   # v7x: 2 TCs share the batch axis
        ),
    )(xt, w1t, b1t, w2t, b2t)

    # Strip action-row padding and batch-lane padding; return (batch, n_actions).
    return out_t[:n_actions, :batch].T


def init_params(key, n_observations, hidden_size, n_actions):
    """Deterministic init mimicking PyTorch nn.Linear default
    (uniform(-1/sqrt(fan_in), 1/sqrt(fan_in))). Weights stored (in, out)."""
    k1, k2, k3, k4 = jax.random.split(key, 4)
    bound1 = 1.0 / jnp.sqrt(n_observations)
    bound2 = 1.0 / jnp.sqrt(hidden_size)
    w1 = jax.random.uniform(k1, (n_observations, hidden_size), jnp.float32,
                            -bound1, bound1)
    b1 = jax.random.uniform(k2, (1, hidden_size), jnp.float32, -bound1, bound1)
    w2 = jax.random.uniform(k3, (hidden_size, n_actions), jnp.float32,
                            -bound2, bound2)
    b2 = jax.random.uniform(k4, (1, n_actions), jnp.float32, -bound2, bound2)
    return w1, b1, w2, b2


def reference_forward(x, w1, b1, w2, b2):
    h = jnp.maximum(x @ w1 + b1, 0.0)
    logits = h @ w2 + b2
    return jax.nn.softmax(logits, axis=-1)


if __name__ == "__main__":
    # CartPole-like sizes: 4 observations, 2 actions, small hidden layer.
    n_observations = 4
    hidden_size = 32
    n_actions = 2

    key = jax.random.PRNGKey(0)
    key_x, key_x2, key_p = jax.random.split(key, 3)
    w1, b1, w2, b2 = init_params(key_p, n_observations, hidden_size, n_actions)

    # 1) Small batch: single grid step, heavy lane padding path (8 -> 128 cols).
    batch = 8
    x = jax.random.normal(key_x, (batch, n_observations), jnp.float32)
    probs = jax.block_until_ready(mc_reinforce_forward(x, w1, b1, w2, b2))
    ref = reference_forward(x, w1, b1, w2, b2)
    assert probs.shape == (batch, n_actions)
    assert jnp.allclose(probs, ref, atol=1e-4, rtol=1e-4)
    assert jnp.allclose(jnp.sum(probs, axis=-1), 1.0, atol=1e-4)

    # 2) Rollout-sized batch: exercises the even 2-step grid (tb = 384) and the
    #    tight batch padding (600 -> 768, vs 1024 in the previous version).
    batch2 = 600
    x2 = jax.random.normal(key_x2, (batch2, n_observations), jnp.float32)
    probs2 = jax.block_until_ready(mc_reinforce_forward(x2, w1, b1, w2, b2))
    ref2 = reference_forward(x2, w1, b1, w2, b2)
    assert probs2.shape == (batch2, n_actions)
    assert jnp.allclose(probs2, ref2, atol=1e-4, rtol=1e-4)
    assert jnp.allclose(jnp.sum(probs2, axis=-1), 1.0, atol=1e-4)

    print("KERNEL_OK")
</pallas_src>

<mosaic_0001>
module attributes {stable_mosaic.version = 11 : i64} {
  func.func @_reinforce_kernel(%arg0: i32, %arg1: memref<8x128xf32, #tpu.memory_space<vmem>>, %arg2: memref<32x8xf32, #tpu.memory_space<vmem>>, %arg3: memref<32x1xf32, #tpu.memory_space<vmem>>, %arg4: memref<8x32xf32, #tpu.memory_space<vmem>>, %arg5: memref<8x1xf32, #tpu.memory_space<vmem>>, %arg6: memref<8x128xf32, #tpu.memory_space<vmem>>) attributes {dimension_semantics = [#tpu.dimension_semantics<parallel>], iteration_bounds = array<i64: 1>, scalar_prefetch = 0 : i64, scratch_operands = 0 : i64, tpu.core_type = #tpu.core_type<tc>, window_params = [{transform_indices = @transform_0, window_bounds = array<i64: 8, 128>}, {pipeline_mode = #tpu.pipeline_mode<synchronous>, transform_indices = @transform_1, window_bounds = array<i64: 32, 8>}, {pipeline_mode = #tpu.pipeline_mode<synchronous>, transform_indices = @transform_2, window_bounds = array<i64: 32, 1>}, {pipeline_mode = #tpu.pipeline_mode<synchronous>, transform_indices = @transform_3, window_bounds = array<i64: 8, 32>}, {pipeline_mode = #tpu.pipeline_mode<synchronous>, transform_indices = @transform_4, window_bounds = array<i64: 8, 1>}, {transform_indices = @transform_5, window_bounds = array<i64: 8, 128>}]} {
    %c0 = arith.constant 0 : index
    %c0_0 = arith.constant 0 : index
    %0 = vector.load %arg2[%c0, %c0_0] : memref<32x8xf32, #tpu.memory_space<vmem>>, vector<32x8xf32>
    %c0_1 = arith.constant 0 : index
    %c0_2 = arith.constant 0 : index
    %1 = vector.load %arg1[%c0_1, %c0_2] : memref<8x128xf32, #tpu.memory_space<vmem>>, vector<8x128xf32>
    %cst = arith.constant dense<0.000000e+00> : vector<32x128xf32>
    %2 = tpu.matmul %0, %1, %cst {dimension_numbers = #tpu.dot_dimension_numbers<[1], [0], [0], [1], [0, 0, 1, 1], [], []>} : vector<32x8xf32>, vector<8x128xf32>, vector<32x128xf32> -> vector<32x128xf32>
    %c0_3 = arith.constant 0 : index
    %c0_4 = arith.constant 0 : index
    %3 = vector.load %arg3[%c0_3, %c0_4] : memref<32x1xf32, #tpu.memory_space<vmem>>, vector<32x1xf32>
    %4 = vector.broadcast %3 : vector<32x1xf32> to vector<32x128xf32>
    %5 = arith.addf %2, %4 : vector<32x128xf32>
    %cst_5 = arith.constant 0.000000e+00 : f32
    %6 = vector.broadcast %cst_5 : f32 to vector<32x128xf32>
    %7 = arith.maximumf %5, %6 : vector<32x128xf32>
    %c0_6 = arith.constant 0 : index
    %c0_7 = arith.constant 0 : index
    %8 = vector.load %arg4[%c0_6, %c0_7] : memref<8x32xf32, #tpu.memory_space<vmem>>, vector<8x32xf32>
    %cst_8 = arith.constant dense<0.000000e+00> : vector<8x128xf32>
    %9 = tpu.matmul %8, %7, %cst_8 {dimension_numbers = #tpu.dot_dimension_numbers<[1], [0], [0], [1], [0, 0, 1, 1], [], []>} : vector<8x32xf32>, vector<32x128xf32>, vector<8x128xf32> -> vector<8x128xf32>
    %c0_9 = arith.constant 0 : index
    %c0_10 = arith.constant 0 : index
    %10 = vector.load %arg5[%c0_9, %c0_10] : memref<8x1xf32, #tpu.memory_space<vmem>>, vector<8x1xf32>
    %11 = vector.broadcast %10 : vector<8x1xf32> to vector<8x128xf32>
    %12 = arith.addf %9, %11 : vector<8x128xf32>
    %cst_11 = arith.constant dense<0xFF800000> : vector<128xf32>
    %13 = vector.multi_reduction <maximumf>, %12, %cst_11 [0] : vector<8x128xf32> to vector<128xf32>
    %14 = vector.shape_cast %13 : vector<128xf32> to vector<1x128xf32>
    %15 = vector.broadcast %14 : vector<1x128xf32> to vector<8x128xf32>
    %16 = arith.subf %12, %15 : vector<8x128xf32>
    %17 = math.exp %16 : vector<8x128xf32>
    %cst_12 = arith.constant dense<0.000000e+00> : vector<128xf32>
    %18 = vector.multi_reduction <add>, %17, %cst_12 [0] : vector<8x128xf32> to vector<128xf32>
    %19 = vector.shape_cast %18 : vector<128xf32> to vector<1x128xf32>
    %20 = tpu.reciprocal %19 {approx = true} : vector<1x128xf32> -> vector<1x128xf32>
    %21 = arith.mulf %19, %20 : vector<1x128xf32>
    %cst_13 = arith.constant 2.000000e+00 : f32
    %22 = vector.broadcast %cst_13 : f32 to vector<1x128xf32>
    %23 = arith.subf %22, %21 : vector<1x128xf32>
    %24 = arith.mulf %20, %23 : vector<1x128xf32>
    %25 = vector.broadcast %24 : vector<1x128xf32> to vector<8x128xf32>
    %26 = arith.mulf %17, %25 : vector<8x128xf32>
    %c0_14 = arith.constant 0 : index
    %c0_15 = arith.constant 0 : index
    %27 = vector.load %arg6[%c0_14, %c0_15] : memref<8x128xf32, #tpu.memory_space<vmem>>, vector<8x128xf32>
    tpu.vector_store %arg6[%c0_14, %c0_15], %26 {strides = array<i32>} : memref<8x128xf32, #tpu.memory_space<vmem>>, vector<8x128xf32>,
    return
  }
  func.func @transform_0(%arg0: i32) -> (i32, i32) {
    %c0_i32 = arith.constant 0 : i32
    %c0_i32_0 = arith.constant 0 : i32
    return %c0_i32, %arg0 : i32, i32
  }
  func.func @transform_1(%arg0: i32) -> (i32, i32) {
    %c0_i32 = arith.constant 0 : i32
    %c0_i32_0 = arith.constant 0 : i32
    %c0_i32_1 = arith.constant 0 : i32
    return %c0_i32, %c0_i32_0 : i32, i32
  }
  func.func @transform_2(%arg0: i32) -> (i32, i32) {
    %c0_i32 = arith.constant 0 : i32
    %c0_i32_0 = arith.constant 0 : i32
    %c0_i32_1 = arith.constant 0 : i32
    return %c0_i32, %c0_i32_0 : i32, i32
  }
  func.func @transform_3(%arg0: i32) -> (i32, i32) {
    %c0_i32 = arith.constant 0 : i32
    %c0_i32_0 = arith.constant 0 : i32
    %c0_i32_1 = arith.constant 0 : i32
    return %c0_i32, %c0_i32_0 : i32, i32
  }
  func.func @transform_4(%arg0: i32) -> (i32, i32) {
    %c0_i32 = arith.constant 0 : i32
    %c0_i32_0 = arith.constant 0 : i32
    %c0_i32_1 = arith.constant 0 : i32
    return %c0_i32, %c0_i32_0 : i32, i32
  }
  func.func @transform_5(%arg0: i32) -> (i32, i32) {
    %c0_i32 = arith.constant 0 : i32
    %c0_i32_0 = arith.constant 0 : i32
    return %c0_i32, %arg0 : i32, i32
  }
}

</mosaic_0001>

<bundles_post_ra>
// kernel: tpu_custom_call.1
= control target key start
LH: loop header
LB: loop body
LE: loop exit
PB: predicated region body
PF: predicated region fallthrough
CT: control target
= control target key end

     0   :  { %vm50_vm0 = vcmask 64512   ;;  %v343_v5 = vmov 0   ;;  %s427_s0 = inlined_call_operand.vmem [shape: f32[8,128], index: 0, kind: input, shape index: {}]   ;;  %s428_s1 = inlined_call_operand.vmem [shape: f32[32,8], index: 1, kind: input, shape index: {}]   ;;  %s429_s2 = inlined_call_operand.vmem [shape: f32[32,1], index: 2, kind: input, shape index: {}]   ;;  %s430_s3 = inlined_call_operand.vmem [shape: f32[8,32], index: 3, kind: input, shape index: {}]   ;;  %s431_s4 = inlined_call_operand.vmem [shape: f32[8,1], index: 4, kind: input, shape index: {}]   ;;  %s432_s5 = inlined_call_operand.hbm [shape: f32[8,128], index: 5, kind: output, shape index: {}]  }
   0x1   :  { %v25_v0 = vld [vmem:[%s427_s0] sm:$0xff]  ;;  %v22_v2 = vld [vmem:[%s428_s1 + $0x8] sm:$0xff]  ;;  %v23_v3 = vld [vmem:[%s428_s1 + $0x10] sm:$0xff]  ;;  %313 = vset.pattern.permute.xlu0 %v343_v5 }
   0x2   :  { %v21_v1 = vld [vmem:[%s428_s1] sm:$0xff]  ;;  %283 = vmatprep.subr.mxu0 %v25_v0  ;;  %v28_v6 = vld [vmem:[%s429_s2 + $0x10] sm:$0xff] }
   0x3   :  { %285 = vmatprep.mubr.msk.f32.mxu0 %vm50_vm0, %v21_v1  ;;  %v26_v4 = vld [vmem:[%s429_s2] sm:$0xff]  ;;  %284 = vmatpush3.msra.mxu0 %v25_v0 }
   0x4   :  { %286 = vmatmul.mubr.msk.f32.vlgmr.msra.gmra.mrb[0].mxu0 %vm50_vm0, %v22_v2  ;;  %32 = vperm.xlu0 %313, %v26_v4  }
   0x5   :  { %10 = vsyncpa [#allocation3], 0  ;;  %288 = vmatprep.mubr.msk.f32.mxu0 %vm50_vm0, %v23_v3  ;;  %v24_v7 = vld [vmem:[%s428_s1 + $0x18] sm:$0xff]  ;;  %v27_v8 = vld [vmem:[%s429_s2 + $0x8] sm:$0xff]  ;;  %314 = vset.pattern.permute.xlu1 %v343_v5  ;;  %v344_v11 = vmov 0.0|0.0   ;;  %vm345_vm1 = vmmov 0  }
   0x6   :  { %42 = vperm.xlu1 %314, %v28_v6   ;;  %v29_v9 = vld [vmem:[%s429_s2 + $0x18] sm:$0xff]  ;;  %v153_v10 = vld [vmem:[%s431_s4] sm:$0xff]  ;;  %302 = vmatprep.subr.bf16.mxu1 %v344_v11  ;;  %v346_v12 = vmov 0.0   ;;  %vm159_vm2 = vcmask 261120  }
   0x7   :  { %299 = vmatprep.mubr.msk.f32.mxu1 %vm345_vm1, %v346_v12  ;;  %v152_v31 = vld [vmem:[%s430_s3] sm:$0xff]  ;;  %s347_s3 = smov [#allocation2]  }
   0x8   :  { %289 = vmatmul.mubr.msk.f32.gmra.mrb[2].mxu0 %vm50_vm0, %v24_v7  ;;  %37 = vperm.xlu0 %313, %v27_v8   ;;  %s260_s4 = sshll.u32 %s347_s3, 4  ;;  %s261_s4 = int_to_ptr.vmem [resolvable:$true] %s260_s4 }
   0x9   :  { %s319_s12 = scalar_lea.vmem %s261_s4, 128  ;;  %p324_p1 = scmp.lt.s32.totalorder %s261_s4, %s261_s4 }
   0xa   :  { %47 = vperm.xlu1 %314, %v29_v9   ;;  %p320_p0 = scmp.ne.s32.totalorder %s261_s4, %s319_s12  ;;  %p325_p2 = scmp.lt.s32.totalorder %s319_s12, %s319_s12 }
   0xc   :  { %156 = vperm.xlu0 %313, %v153_v10   ;;  %p326_p3 = por %p325_p2, %p324_p1 }
   0xe   :  { %p327_p4 = pnand %p326_p3, %p320_p0 }
  0x83   :  { %v33_v13 = vpop.permute.xlu0 %32 }
  0x85   :  { %v43_v14 = vpop.permute.xlu1 %42 }
  0x87   :  { %v38_v15 = vpop.permute.xlu0 %37 }
  0x89   :  { %v48_v21 = vpop.permute.xlu1 %47 }
  0x8b   :  { %v157_v32 = vpop.permute.xlu0 %156 }
  0xd7   :  { %v287_v16 = vpop.f32.mrb[0].mxu0 }
  0xd8   :  { %v135_v17 = vadd.f32 %v287_v16, %v38_v15  ;;  %v129_v18 = vpop.f32.mrb[1].mxu0 }
  0xd9   :  { %v130_v19 = vadd.f32 %v129_v18, %v33_v13 }
  0xda   :  { %v149_v20 = vmax.f32 %v135_v17, 0.0 }
  0xdb   :  { %v148_v22 = vmax.f32 %v130_v19, 0.0  ;;  %v290_v23 = vpop.f32.mrb[2].mxu0 }
  0xdc   :  { %v145_v24 = vadd.f32 %v290_v23, %v48_v21  ;;  %v139_v25 = vpop.f32.mrb[3].mxu0 }
  0xdd   :  { %v140_v26 = vadd.f32 %v139_v25, %v43_v14  ;;  %v303_v27 = vpack.c.bf16 %v149_v20, %v148_v22 }
  0xde   :  { %v151_v28 = vmax.f32 %v145_v24, 0.0 }
  0xdf   :  { %v150_v29 = vmax.f32 %v140_v26, 0.0  ;;  %304 = vmatpush3.bf16.msra.mxu1 %v303_v27 }
  0xe0   :  { %305 = vmatprep.subr.bf16.mxu1 %v344_v11 }
  0xe1   :  { %v306_v30 = vpack.c.bf16 %v151_v28, %v150_v29 }
  0xe3   :  { %307 = vmatpush3.bf16.msra.mxu1 %v306_v30 }
  0xe6   :  { %300 = vmatmul.mubr.msk.f32.vlgmr.msra.gmra.mrb[0].mxu1 %vm159_vm2, %v152_v31 }
 0x1b9   :  { %v229_v33 = vpop.f32.mrb[0].mxu1 }
 0x1ba   :  { %v230_v34 = vadd.f32 %v229_v33, %v157_v32  ;;  %v301_v35 = vpop.f32.mrb[1].mxu1 }
 0x1bc   :  { %v233_v36 = vrot.slane %v230_v34, 4 }
 0x1be   :  { %v234_v37 = vmax.f32 %v230_v34, %v233_v36 }
 0x1c0   :  { %v235_v38 = vrot.slane %v234_v37, 2 }
 0x1c2   :  { %v236_v39 = vmax.f32 %v234_v37, %v235_v38 }
 0x1c4   :  { %v237_v40 = vrot.slane %v236_v39, 1 }
 0x1c6   :  { %v238_v41 = vmax.f32 %v236_v39, %v237_v40 }
 0x1c8   :  { %v239_v42 = vsub.f32 %v230_v34, %v238_v41 }
 0x1ca   :  { %v240_v43 = vmul.f32 1.442695, %v239_v42 }
 0x1cc   :  { %315 = vpow2.f32 %v240_v43 }
 0x1d6   :  { %v316_v44 = vpop.eup %315 }
 0x1d7   :  { %v242_v45 = vrot.slane %v316_v44, 4 }
 0x1d9   :  { %v243_v46 = vadd.f32 %v316_v44, %v242_v45 }
 0x1db   :  { %v244_v47 = vrot.slane %v243_v46, 2 }
 0x1dd   :  { %v245_v48 = vadd.f32 %v244_v47, %v243_v46 }
 0x1df   :  { %v246_v49 = vrot.slane %v245_v48, 1 }
 0x1e1   :  { %v247_v50 = vadd.f32 %v246_v49, %v245_v48 }
 0x1e3   :  { %317 = vrcp.f32 %v247_v50 }
 0x1ed   :  { %v318_v51 = vpop.eup %317 }
 0x1ee   :  { %v249_v52 = vmul.f32 %v318_v51, %v247_v50 }
 0x1f0   :  { %v250_v53 = vsub.f32 2.0, %v249_v52 }
 0x1f2   :  { %v251_v54 = vmul.f32 %v318_v51, %v250_v53 }
 0x1f4   :  { %v252_v55 = vmul.f32 %v316_v44, %v251_v54 }
 0x1f6   :  { %253 = vst [vmem:[#allocation2] sm:$0xff] %v252_v55 }
 0x1f7   :  { %330 = shalt.err (!%p327_p4)
}
 0x1f8   :  { %s331_s15 = scalar_lea.hbm %s432_s5, 128 }
 0x1f9   :  { %p332_p5 = scmp.ne.s32.totalorder %s432_s5, %s331_s15  ;;  %p335_p6 = scmp.lt.u32.totalorder %s331_s15, %s432_s5 }
 0x1fb   :  { %p337_p7 = pnand %p335_p6, %p332_p5 }
 0x1fd   :  { %340 = shalt.err (!%p337_p7)
}
 0x1fe   :  { %263 = dma.vmem_to_hbm [thread:$0]  %s261_s4, 128, %s432_s5, [#allocation3]  }
 0x1ff   :  { %341 = dma.done.wait [#allocation3], 128  }
 0x200   :  { %342 = vsyncadd [#allocation3], 4294967168 }
 0x201   :  { %267 = vsyncpa [#allocation3], 1 }

</bundles_post_ra>
